<compile_context>
chip_gen: v7x
topology: tpu7x:2x2x1
jax: 0.10.0
libtpu: 0.0.40
codegen_flags: <defaults>
</compile_context>

<pallas_src>
import functools

import jax
import jax.numpy as jnp
from jax.experimental import pallas as pl
from jax.experimental.pallas import tpu as pltpu


def _calib_kernel(logits_ref, labels_ref, calib_ref, temp_ref, *, temp):
    x = logits_ref[...]                               # [TB, C], native dtype (no f32 upcast)
    labels = labels_ref[...]                          # [TB, 1] int32
    tb, c = x.shape

    col = jax.lax.broadcasted_iota(jnp.int32, (tb, c), 1)
    is_label = col == labels                          # [TB, C] bool (no float one-hot mults)

    # torch.argmax tie-break = lowest index: first column achieving the row max.
    row_max = jnp.max(x, axis=-1, keepdims=True)      # [TB, 1]
    first_max = jnp.min(jnp.where(x == row_max, col, c),
                        axis=-1, keepdims=True)       # [TB, 1] int32
    correct = first_max == labels                     # [TB, 1] bool

    calib_ref[...] = jnp.where(correct, x, is_label.astype(x.dtype))
    temp_ref[...] = jnp.where(correct, jnp.float32(temp),
                              jnp.float32(1.0)).astype(jnp.float32)


def _vmem_capacity_bytes():
    """Physical VMEM of the attached TPU; conservative 64 MiB (v7x) fallback."""
    try:
        return int(pltpu.get_tpu_info().vmem_capacity_bytes)
    except Exception:
        return 64 << 20


def logit_calibration2(teacher_logits, true_labels, temp, *, tb=None,
                       donate_logits=False):
    """teacher_logits: [B, C] float; true_labels: [B] int.

    Returns (calibrated_logits [B, C], teachertemp [B] float32).
    """
    B, C = teacher_logits.shape
    dtype = teacher_logits.dtype
    itemsize = jnp.dtype(dtype).itemsize

    # dtype-aware sublane multiple: 8 for f32, 16 for bf16, 32 for 8-bit.
    sub = max(8, 8 * (4 // itemsize))
    # Lane-padded width (what a row actually occupies in VMEM) for sizing only.
    Cp = max(128, pl.cdiv(C, 128) * 128)

    capacity = _vmem_capacity_bytes()

    # --- auto-size the batch tile ------------------------------------------
    pair_bytes_per_row = 2 * Cp * itemsize            # one input row + one output row
    if tb is None:
        pair_budget = capacity // 4                   # double-buffering doubles this
        tb = (pair_budget // pair_bytes_per_row // sub) * sub
        tb = max(sub, min(1024, tb))
    # Clamp any tb (auto or user) so the double-buffered in+out footprint
    # leaves >= 16 MiB of VMEM free (critical on v7x's 64 MiB VMEM).
    dbuf_cap = max(4 * sub * Cp * itemsize, capacity - (16 << 20))
    tb_vmem_max = max(sub, (dbuf_cap // (4 * Cp * itemsize) // sub) * sub)
    tb = min(tb, tb_vmem_max)
    # Keep >= 2 grid steps whenever possible so v7x's two TensorCores both get
    # work under dimension_semantics=("parallel",); harmless on 1-TC chips.
    half = max(sub, pl.cdiv(pl.cdiv(B, 2), sub) * sub)
    tb = min(tb, half)
    tb = max(sub, (tb // sub) * sub)

    grid = (pl.cdiv(B, tb),)                          # ragged edge block: writes are clipped

    dbuf_bytes = 4 * tb * Cp * itemsize + 4 * tb * 8  # in+out logits (x2 buffers) + labels/temp
    vmem_limit = int(min(max(dbuf_bytes + (4 << 20), 16 << 20),
                         max(16 << 20, capacity - (16 << 20))))

    labels2d = true_labels.astype(jnp.int32).reshape(B, 1)

    kernel = functools.partial(_calib_kernel, temp=float(temp))
    cost = pl.CostEstimate(
        flops=6 * B * C,
        transcendentals=0,
        bytes_accessed=2 * B * C * itemsize + 8 * B,
    )

    calib, ttemp = pl.pallas_call(
        kernel,
        out_shape=(
            jax.ShapeDtypeStruct((B, C), dtype),
            jax.ShapeDtypeStruct((B, 1), jnp.float32),
        ),
        grid=grid,
        in_specs=[
            pl.BlockSpec((tb, C), lambda i: (i, 0)),   # logits tile (full class axis)
            pl.BlockSpec((tb, 1), lambda i: (i, 0)),   # labels tile
        ],
        out_specs=(
            pl.BlockSpec((tb, C), lambda i: (i, 0)),   # calibrated logits
            pl.BlockSpec((tb, 1), lambda i: (i, 0)),   # teachertemp
        ),
        compiler_params=pltpu.CompilerParams(
            dimension_semantics=("parallel",),          # lets v7x shard the batch grid over 2 TCs
            vmem_limit_bytes=vmem_limit,
        ),
        cost_estimate=cost,
        input_output_aliases=({0: 0} if donate_logits else {}),
    )(teacher_logits, labels2d)

    return calib, ttemp.reshape(B)


def _reference(teacher_logits, true_labels, temp):
    """Pure-JAX reference mirroring the PyTorch loop (vectorized)."""
    C = teacher_logits.shape[1]
    pred = jnp.argmax(teacher_logits, axis=1)
    correct = pred == true_labels
    onehot = jax.nn.one_hot(true_labels, C, dtype=teacher_logits.dtype)
    calibrated = jnp.where(correct[:, None], teacher_logits, onehot)
    teachertemp = jnp.where(correct, jnp.float32(temp), jnp.float32(1.0))
    return calibrated, teachertemp


if __name__ == "__main__":
    key = jax.random.PRNGKey(0)
    k_logits, k_labels = jax.random.split(key)

    B, C = 8, 16
    temp = 0.5

    teacher_logits = jax.random.uniform(k_logits, (B, C), dtype=jnp.float32)
    true_labels = jax.random.randint(k_labels, (B,), 0, C, dtype=jnp.int32)
    # Force a few "correctly predicted" rows so both branches are exercised.
    true_labels = true_labels.at[:4].set(jnp.argmax(teacher_logits[:4], axis=1))

    calib, ttemp = logit_calibration2(teacher_logits, true_labels, temp)
    calib, ttemp = jax.block_until_ready((calib, ttemp))

    ref_calib, ref_temp = _reference(teacher_logits, true_labels, temp)
    assert calib.shape == (B, C) and ttemp.shape == (B,)
    assert jnp.array_equal(calib, ref_calib)
    assert jnp.array_equal(ttemp, ref_temp)

    print("KERNEL_OK")
</pallas_src>

<mosaic_0001>
module attributes {stable_mosaic.version = 11 : i64} {
  func.func @_calib_kernel(%arg0: i32, %arg1: memref<8x16xf32, #tpu.memory_space<vmem>>, %arg2: memref<8x1xi32, #tpu.memory_space<vmem>>, %arg3: memref<8x16xf32, #tpu.memory_space<vmem>>, %arg4: memref<8x1xf32, #tpu.memory_space<vmem>>) attributes {dimension_semantics = [#tpu.dimension_semantics<parallel>], iteration_bounds = array<i64: 1>, scalar_prefetch = 0 : i64, scratch_operands = 0 : i64, tpu.core_type = #tpu.core_type<tc>, window_params = [{transform_indices = @transform_0, window_bounds = array<i64: 8, 16>}, {transform_indices = @transform_1, window_bounds = array<i64: 8, 1>}, {transform_indices = @transform_2, window_bounds = array<i64: 8, 16>}, {transform_indices = @transform_3, window_bounds = array<i64: 8, 1>}]} {
    %c0 = arith.constant 0 : index
    %c0_0 = arith.constant 0 : index
    %0 = vector.load %arg1[%c0, %c0_0] : memref<8x16xf32, #tpu.memory_space<vmem>>, vector<8x16xf32>
    %c0_1 = arith.constant 0 : index
    %c0_2 = arith.constant 0 : index
    %1 = vector.load %arg2[%c0_1, %c0_2] : memref<8x1xi32, #tpu.memory_space<vmem>>, vector<8x1xi32>
    %2 = tpu.iota {dimensions = array<i32: 1>} : vector<8x16xi32>
    %3 = vector.broadcast %1 : vector<8x1xi32> to vector<8x16xi32>
    %4 = arith.cmpi eq, %2, %3 : vector<8x16xi32>
    %cst = arith.constant dense<0xFF800000> : vector<8xf32>
    %5 = vector.multi_reduction <maximumf>, %0, %cst [1] : vector<8x16xf32> to vector<8xf32>
    %6 = vector.shape_cast %5 : vector<8xf32> to vector<8x1xf32>
    %7 = vector.broadcast %6 : vector<8x1xf32> to vector<8x16xf32>
    %8 = arith.cmpf oeq, %0, %7 : vector<8x16xf32>
    %c16_i32 = arith.constant 16 : i32
    %9 = vector.broadcast %c16_i32 : i32 to vector<8x16xi32>
    %10 = arith.select %8, %2, %9 : vector<8x16xi1>, vector<8x16xi32>
    %cst_3 = arith.constant dense<2147483647> : vector<8xi32>
    %11 = vector.multi_reduction <minsi>, %10, %cst_3 [1] : vector<8x16xi32> to vector<8xi32>
    %12 = vector.shape_cast %11 : vector<8xi32> to vector<8x1xi32>
    %13 = arith.cmpi eq, %12, %1 : vector<8x1xi32>
    %14 = arith.extui %4 : vector<8x16xi1> to vector<8x16xi32>
    %15 = arith.sitofp %14 : vector<8x16xi32> to vector<8x16xf32>
    %16 = vector.shape_cast %13 : vector<8x1xi1> to vector<8x1xi1>
    %17 = vector.broadcast %16 : vector<8x1xi1> to vector<8x16xi1>
    %18 = arith.select %17, %0, %15 : vector<8x16xi1>, vector<8x16xf32>
    %c0_4 = arith.constant 0 : index
    %c0_5 = arith.constant 0 : index
    %19 = vector.load %arg3[%c0_4, %c0_5] : memref<8x16xf32, #tpu.memory_space<vmem>>, vector<8x16xf32>
    tpu.vector_store %arg3[%c0_4, %c0_5], %18 {strides = array<i32>} : memref<8x16xf32, #tpu.memory_space<vmem>>, vector<8x16xf32>,
    %cst_6 = arith.constant 5.000000e-01 : f32
    %cst_7 = arith.constant 1.000000e+00 : f32
    %20 = vector.broadcast %cst_6 : f32 to vector<8x1xf32>
    %21 = vector.broadcast %cst_7 : f32 to vector<8x1xf32>
    %22 = arith.select %13, %20, %21 : vector<8x1xi1>, vector<8x1xf32>
    %c0_8 = arith.constant 0 : index
    %c0_9 = arith.constant 0 : index
    %23 = vector.load %arg4[%c0_8, %c0_9] : memref<8x1xf32, #tpu.memory_space<vmem>>, vector<8x1xf32>
    tpu.vector_store %arg4[%c0_8, %c0_9], %22 {strides = array<i32>} : memref<8x1xf32, #tpu.memory_space<vmem>>, vector<8x1xf32>,
    return
  }
  func.func @transform_0(%arg0: i32) -> (i32, i32) {
    %c0_i32 = arith.constant 0 : i32
    %c0_i32_0 = arith.constant 0 : i32
    return %arg0, %c0_i32 : i32, i32
  }
  func.func @transform_1(%arg0: i32) -> (i32, i32) {
    %c0_i32 = arith.constant 0 : i32
    %c0_i32_0 = arith.constant 0 : i32
    return %arg0, %c0_i32 : i32, i32
  }
  func.func @transform_2(%arg0: i32) -> (i32, i32) {
    %c0_i32 = arith.constant 0 : i32
    %c0_i32_0 = arith.constant 0 : i32
    return %arg0, %c0_i32 : i32, i32
  }
  func.func @transform_3(%arg0: i32) -> (i32, i32) {
    %c0_i32 = arith.constant 0 : i32
    %c0_i32_0 = arith.constant 0 : i32
    return %arg0, %c0_i32 : i32, i32
  }
}

</mosaic_0001>

<bundles_post_ra>
// kernel: tpu_custom_call.1
= control target key start
LH: loop header
LB: loop body
LE: loop exit
PB: predicated region body
PF: predicated region fallthrough
CT: control target
= control target key end

     0   :  { %vm22_vm0 = vcmask 130048   ;;  %s153_s0 = inlined_call_operand.vmem [shape: f32[8,16], index: 0, kind: input, shape index: {}]   ;;  %s154_s1 = inlined_call_operand.vmem [shape: s32[8,1], index: 1, kind: input, shape index: {}]   ;;  %s155_s2 = inlined_call_operand.hbm [shape: f32[8,16], index: 2, kind: output, shape index: {0}]   ;;  %s156_s3 = inlined_call_operand.vmem [shape: f32[8,1], index: 3, kind: output, shape index: {1}]  }
   0x1   :  { %v14_v0 = vld [vmem:[%s153_s0] sm:$0xff] }
   0x2   :  { %9 = vsyncpa [#allocation3], 0  ;;  %v23_v1 = vsel %vm22_vm0, %v14_v0, -inf  ;;  %v16_v2 = vlaneseq  ;;  %v15_v13 = vld [vmem:[%s154_s1] sm:$0xff]  ;;  %v105_v14 = vmov 0   ;;  %vm54_vm3 = vcmask 7168  }
   0x3   :  { %24 = vmax.xlane.f32.xlu0 %v23_v1  ;;  %79 = vset.pattern.permute.xlu1 %v105_v14  ;;  %v106_v21 = vmov 1.0   ;;  %s107_s1 = smov [#allocation2]   ;;  %v108_v24 = vmov 0.0  }
   0x4   :  { %v17_v3 = vand.u32 127, %v16_v2  ;;  %80 = vset.pattern.permute.xlu0 %v105_v14  ;;  %s62_s17 = sshll.u32 %s107_s1, 4  ;;  %s63_s17 = int_to_ptr.vmem [resolvable:$true] %s62_s17 }
   0x5   :  { %s81_s18 = scalar_lea.vmem %s63_s17, 128  ;;  %p86_p1 = scmp.lt.s32.totalorder %s63_s17, %s63_s17 }
   0x6   :  { %p82_p0 = scmp.ne.s32.totalorder %s63_s17, %s81_s18  ;;  %p87_p2 = scmp.lt.s32.totalorder %s81_s18, %s81_s18 }
   0x8   :  { %p88_p3 = por %p87_p2, %p86_p1 }
   0xa   :  { %p89_p4 = pnand %p88_p3, %p82_p0 }
  0x90   :  { %v25_v4 = vpop.xlane.xlu0 %24 }
  0x91   :  { %vm26_vm1 = vcmp.eq.f32.partialorder %v14_v0, %v25_v4 }
  0x92   :  { %v27_v5 = vsel %vm26_vm1, %v17_v3, 16 }
  0x93   :  { %v28_v6 = vsel %vm22_vm0, %v27_v5, 2147483647 }
  0x94   :  { %v30_v7 = vshra.s32 %v28_v6, 16  ;;  %v29_v9 = vand.u32 65535, %v28_v6 }
  0x96   :  { %v32_v8 = vcvt.s32.f32 %v30_v7  ;;  %v31_v11 = vcvt.s32.f32 %v29_v9 }
  0x98   :  { %33 = vmin.xlane.f32.xlu0 %v32_v8 }
 0x125   :  { %v34_v10 = vpop.xlane.xlu0 %33 }
 0x126   :  { %vm35_vm2 = vcmp.eq.f32.partialorder %v32_v8, %v34_v10  ;;  %v40_v15 = vcvt.f32.s32 %v34_v10 }
 0x127   :  { %v36_v12 = vsel %vm35_vm2, %v31_v11, inf }
 0x128   :  { %37 = vmin.xlane.f32.xlu1 %v36_v12  ;;  %v41_v17 = vshll.u32 %v40_v15, 16 }
 0x139   :  { %19 = vperm.xlu1 %79, %v15_v13  }
 0x1b5   :  { %v38_v16 = vpop.xlane.xlu1 %37 }
 0x1b6   :  { %v39_v18 = vcvt.f32.s32 %v38_v16 }
 0x1b8   :  { %v42_v19 = vadd.s32 %v41_v17, %v39_v18 }
 0x1b9   :  { %v20_v23 = vpop.permute.xlu1 %19 }
 0x1ba   :  { %vm43_vm4 = vcmp.eq.s32.totalorder %v42_v19, %v15_v13  ;;  %vm21_vm5 = vcmp.eq.s32.totalorder %v17_v3, %v20_v23 }
 0x1bb   :  { %v46_v20 = vsel %vm43_vm4, 1, %v105_v14  ;;  %v53_v22 = vsel %vm43_vm4, 0.5, %v106_v21  ;;  %v74_v25 = vsel %vm21_vm5, 1.0, %v108_v24 }
 0x1bc   :  { %55 = vst.msk [vmem:[%s156_s3] sm:$0xff] %vm54_vm3, %v53_v22  ;;  %48 = vperm.xlu0 %80, %v46_v20  }
 0x23b   :  { %v49_v26 = vpop.permute.xlu0 %48 }
 0x23c   :  { %vm50_vm6 = vcmp.eq.s32.totalorder %v49_v26, 1 }
 0x23d   :  { %v51_v27 = vsel %vm50_vm6, %v14_v0, %v74_v25 }
 0x23e   :  { %52 = vst.msk [vmem:[#allocation2] sm:$0xff] %vm22_vm0, %v51_v27 }
 0x23f   :  { %92 = shalt.err (!%p89_p4)
}
 0x240   :  { %s93_s20 = scalar_lea.hbm %s155_s2, 128 }
 0x241   :  { %p94_p5 = scmp.ne.s32.totalorder %s155_s2, %s93_s20  ;;  %p97_p6 = scmp.lt.u32.totalorder %s93_s20, %s155_s2 }
 0x243   :  { %p99_p7 = pnand %p97_p6, %p94_p5 }
 0x245   :  { %102 = shalt.err (!%p99_p7)
}
 0x246   :  { %65 = dma.vmem_to_hbm [thread:$0]  %s63_s17, 128, %s155_s2, [#allocation3]  }
 0x247   :  { %103 = dma.done.wait [#allocation3], 128  }
 0x248   :  { %104 = vsyncadd [#allocation3], 4294967168 }
 0x249   :  { %73 = vsyncpa [#allocation3], 1 }

</bundles_post_ra>
